<compile_context>
chip_gen: v6e
topology: v6e:2x2x1
jax: 0.10.0
libtpu: 0.0.40
codegen_flags: <defaults>
</compile_context>

<pallas_src>
import jax
import jax.numpy as jnp
from jax.experimental import pallas as pl
from jax.experimental.pallas import tpu as pltpu


def _loss_kernel(dist_ref, levels_ref, p1_ref, p2_ref, p3_ref, out_ref):
    dist = dist_ref[...]            # (BM, L)
    levels = levels_ref[...]        # (BM, L)
    p1 = p1_ref[...]                # (BM, 1)
    p2 = p2_ref[...]                # (BM, 1)
    p3 = p3_ref[...]                # (BM, 1)

    # takes = (levels > p1) & (levels < p2)
    takes = jnp.logical_and(levels > p1, levels < p2)

    # ratio = (levels - p3) / levels  via EUP reciprocal (free slot) + VPU mul
    inv_levels = pl.reciprocal(levels, approx=False)
    ratio = (levels - p3) * inv_levels

    # fused mask/select/multiply: pnl = takes * distribution * ratio
    pnl = jnp.where(takes, dist * ratio, 0.0)

    # per-row sum over levels (XLU lane reduce), clamp, log (EUP)
    row = jnp.sum(pnl, axis=1, keepdims=True)          # (BM, 1)
    logv = jnp.log(jnp.maximum(row, 1e-8))             # (BM, 1)

    # partial sum of logs for this batch block -> SMEM scalar
    out_ref[0, 0] = jnp.sum(logv)


def _choose_block_rows(B, L):
    """Pick a batch-block size BM that divides B, is (8,128)-friendly, and
    keeps the double-buffered VMEM footprint safe on v7x (64 MiB)."""
    # ~2M f32 elems per (BM, L) tile: 2 big inputs x 2 buffers x 8 MiB = 32 MiB.
    max_elems = 2 * 1024 * 1024
    bm_cap = max(8, (max_elems // max(L, 1)) // 8 * 8)
    if B <= bm_cap:
        return B                      # whole batch in one block (small-B path)
    for bm in range(bm_cap, 7, -8):   # largest multiple of 8 dividing B
        if B % bm == 0:
            return bm
    return B                          # fallback: correctness over tiling


def pallas_loss(distribution, levels, price):
    distribution = distribution.astype(jnp.float32)
    levels = levels.astype(jnp.float32)
    price = price.astype(jnp.float32)

    B, L = distribution.shape
    BM = _choose_block_rows(B, L)
    num_blocks = B // BM

    # Wrapper-side column slicing (free in XLA, avoids lane-sparse (B,4) tile).
    p1 = price[:, 1:2]
    p2 = price[:, 2:3]
    p3 = price[:, 3:4]

    row_map = lambda i: (i, 0)

    partials = pl.pallas_call(
        _loss_kernel,
        out_shape=jax.ShapeDtypeStruct((num_blocks, 1), jnp.float32),
        grid=(num_blocks,),
        in_specs=[
            pl.BlockSpec((BM, L), row_map),   # distribution
            pl.BlockSpec((BM, L), row_map),   # levels
            pl.BlockSpec((BM, 1), row_map),   # price[:, 1]
            pl.BlockSpec((BM, 1), row_map),   # price[:, 2]
            pl.BlockSpec((BM, 1), row_map),   # price[:, 3]
        ],
        out_specs=pl.BlockSpec(
            (1, 1), row_map, memory_space=pltpu.MemorySpace.SMEM
        ),
        compiler_params=pltpu.CompilerParams(
            dimension_semantics=("parallel",),
        ),
    )(distribution, levels, p1, p2, p3)

    # Final mean over the batch done in the wrapper (partials-then-reduce).
    return jnp.sum(partials) / jnp.float32(B)


def reference_loss(distribution, levels, price):
    takes = (levels > price[:, 1:2]) & (levels < price[:, 2:3])
    taken = takes * distribution
    pnl = taken * ((levels - price[:, 3:4]) / levels)
    pnl = pnl.sum(axis=1)
    pnl = jnp.log(jnp.maximum(pnl, 1e-8))
    return pnl.mean()


if __name__ == "__main__":
    B, L = 8, 128
    key = jax.random.PRNGKey(0)
    k1, k2, k3 = jax.random.split(key, 3)

    # distribution: positive weights that roughly sum to 1 per row
    distribution = jax.random.uniform(k1, (B, L), dtype=jnp.float32)
    distribution = distribution / jnp.sum(distribution, axis=1, keepdims=True)

    # levels: strictly positive prices in [50, 150)
    levels = 50.0 + 100.0 * jax.random.uniform(k2, (B, L), dtype=jnp.float32)

    # price: (B, 4); cols 1,2 define the (low, high) band, col 3 the ref price
    low = 60.0 + 20.0 * jax.random.uniform(k3, (B, 1), dtype=jnp.float32)
    high = low + 40.0
    ref_px = low + 10.0
    open_px = low  # unused by forward
    price = jnp.concatenate([open_px, low, high, ref_px], axis=1).astype(jnp.float32)

    out = pallas_loss(distribution, levels, price)
    out = jax.block_until_ready(out)

    ref = reference_loss(distribution, levels, price)
    assert jnp.allclose(out, ref, rtol=1e-5, atol=1e-5), (out, ref)

    print("KERNEL_OK")
</pallas_src>

<mosaic_0001>
module attributes {stable_mosaic.version = 11 : i64} {
  func.func @_loss_kernel(%arg0: i32, %arg1: memref<8x128xf32, #tpu.memory_space<vmem>>, %arg2: memref<8x128xf32, #tpu.memory_space<vmem>>, %arg3: memref<8x1xf32, #tpu.memory_space<vmem>>, %arg4: memref<8x1xf32, #tpu.memory_space<vmem>>, %arg5: memref<8x1xf32, #tpu.memory_space<vmem>>, %arg6: memref<1x1xf32, #tpu.memory_space<smem>>) attributes {dimension_semantics = [#tpu.dimension_semantics<parallel>], iteration_bounds = array<i64: 1>, scalar_prefetch = 0 : i64, scratch_operands = 0 : i64, tpu.core_type = #tpu.core_type<tc>, window_params = [{transform_indices = @transform_0, window_bounds = array<i64: 8, 128>}, {transform_indices = @transform_1, window_bounds = array<i64: 8, 128>}, {transform_indices = @transform_2, window_bounds = array<i64: 8, 1>}, {transform_indices = @transform_3, window_bounds = array<i64: 8, 1>}, {transform_indices = @transform_4, window_bounds = array<i64: 8, 1>}, {transform_indices = @transform_5, window_bounds = array<i64: 1, 1>}]} {
    %c0 = arith.constant 0 : index
    %c0_0 = arith.constant 0 : index
    %0 = vector.load %arg1[%c0, %c0_0] : memref<8x128xf32, #tpu.memory_space<vmem>>, vector<8x128xf32>
    %c0_1 = arith.constant 0 : index
    %c0_2 = arith.constant 0 : index
    %1 = vector.load %arg2[%c0_1, %c0_2] : memref<8x128xf32, #tpu.memory_space<vmem>>, vector<8x128xf32>
    %c0_3 = arith.constant 0 : index
    %c0_4 = arith.constant 0 : index
    %2 = vector.load %arg3[%c0_3, %c0_4] : memref<8x1xf32, #tpu.memory_space<vmem>>, vector<8x1xf32>
    %c0_5 = arith.constant 0 : index
    %c0_6 = arith.constant 0 : index
    %3 = vector.load %arg4[%c0_5, %c0_6] : memref<8x1xf32, #tpu.memory_space<vmem>>, vector<8x1xf32>
    %c0_7 = arith.constant 0 : index
    %c0_8 = arith.constant 0 : index
    %4 = vector.load %arg5[%c0_7, %c0_8] : memref<8x1xf32, #tpu.memory_space<vmem>>, vector<8x1xf32>
    %5 = vector.broadcast %2 : vector<8x1xf32> to vector<8x128xf32>
    %6 = arith.cmpf ogt, %1, %5 : vector<8x128xf32>
    %7 = vector.broadcast %3 : vector<8x1xf32> to vector<8x128xf32>
    %8 = arith.cmpf olt, %1, %7 : vector<8x128xf32>
    %9 = arith.andi %6, %8 : vector<8x128xi1>
    %10 = tpu.reciprocal %1 : vector<8x128xf32> -> vector<8x128xf32>
    %11 = vector.broadcast %4 : vector<8x1xf32> to vector<8x128xf32>
    %12 = arith.subf %1, %11 : vector<8x128xf32>
    %13 = arith.mulf %12, %10 : vector<8x128xf32>
    %14 = arith.mulf %0, %13 : vector<8x128xf32>
    %cst = arith.constant 0.000000e+00 : f32
    %15 = vector.broadcast %cst : f32 to vector<8x128xf32>
    %16 = arith.select %9, %14, %15 : vector<8x128xi1>, vector<8x128xf32>
    %cst_9 = arith.constant dense<0.000000e+00> : vector<8xf32>
    %17 = vector.multi_reduction <add>, %16, %cst_9 [1] : vector<8x128xf32> to vector<8xf32>
    %18 = vector.shape_cast %17 : vector<8xf32> to vector<8x1xf32>
    %cst_10 = arith.constant 9.99999993E-9 : f32
    %19 = vector.broadcast %cst_10 : f32 to vector<8x1xf32>
    %20 = arith.maximumf %18, %19 : vector<8x1xf32>
    %21 = math.log %20 : vector<8x1xf32>
    %22 = vector.shape_cast %21 : vector<8x1xf32> to vector<1x8x1xf32>
    %cst_11 = arith.constant dense<0.000000e+00> : vector<1xf32>
    %23 = vector.multi_reduction <add>, %22, %cst_11 [1, 2] : vector<1x8x1xf32> to vector<1xf32>
    %24 = vector.shape_cast %23 : vector<1xf32> to vector<1x1x1xf32>
    %25 = vector.extract %24[0, 0, 0] : f32 from vector<1x1x1xf32>
    %c0_12 = arith.constant 0 : index
    %c0_13 = arith.constant 0 : index
    %26 = memref.load %arg6[%c0_12, %c0_13] : memref<1x1xf32, #tpu.memory_space<smem>>
    memref.store %25, %arg6[%c0_12, %c0_13] : memref<1x1xf32, #tpu.memory_space<smem>>
    return
  }
  func.func @transform_0(%arg0: i32) -> (i32, i32) {
    %c0_i32 = arith.constant 0 : i32
    %c0_i32_0 = arith.constant 0 : i32
    return %arg0, %c0_i32 : i32, i32
  }
  func.func @transform_1(%arg0: i32) -> (i32, i32) {
    %c0_i32 = arith.constant 0 : i32
    %c0_i32_0 = arith.constant 0 : i32
    return %arg0, %c0_i32 : i32, i32
  }
  func.func @transform_2(%arg0: i32) -> (i32, i32) {
    %c0_i32 = arith.constant 0 : i32
    %c0_i32_0 = arith.constant 0 : i32
    return %arg0, %c0_i32 : i32, i32
  }
  func.func @transform_3(%arg0: i32) -> (i32, i32) {
    %c0_i32 = arith.constant 0 : i32
    %c0_i32_0 = arith.constant 0 : i32
    return %arg0, %c0_i32 : i32, i32
  }
  func.func @transform_4(%arg0: i32) -> (i32, i32) {
    %c0_i32 = arith.constant 0 : i32
    %c0_i32_0 = arith.constant 0 : i32
    return %arg0, %c0_i32 : i32, i32
  }
  func.func @transform_5(%arg0: i32) -> (i32, i32) {
    %c0_i32 = arith.constant 0 : i32
    %c0_i32_0 = arith.constant 0 : i32
    return %arg0, %c0_i32 : i32, i32
  }
}

</mosaic_0001>

<bundles_post_ra>
// kernel: tpu_custom_call.1
= control target key start
LH: loop header
LB: loop body
LE: loop exit
PB: predicated region body
PF: predicated region fallthrough
CT: control target
= control target key end

     0   :  { %v100_v2 = vmov 0   ;;  %s150_s0 = inlined_call_operand.vmem [shape: f32[8,128], index: 0, kind: input, shape index: {}]   ;;  %s151_s1 = inlined_call_operand.vmem [shape: f32[8,128], index: 1, kind: input, shape index: {}]   ;;  %s152_s2 = inlined_call_operand.vmem [shape: f32[8,1], index: 2, kind: input, shape index: {}]   ;;  %s153_s3 = inlined_call_operand.vmem [shape: f32[8,1], index: 3, kind: input, shape index: {}]   ;;  %s154_s4 = inlined_call_operand.vmem [shape: f32[8,1], index: 4, kind: input, shape index: {}]   ;;  %s155_s5 = inlined_call_operand.hbm [shape: f32[1,1], index: 5, kind: output, shape index: {}]  }
   0x1   :  { %v25_v0 = vld [vmem:[%s154_s4] sm:$0xff]  ;;  %84 = vset.pattern.permute.xlu0 %v100_v2  ;;  %85 = vset.pattern.permute.xlu1 %v100_v2 }
   0x2   :  { %v24_v1 = vld [vmem:[%s153_s3] sm:$0xff] }
   0x3   :  { %10 = vsyncpa [#allocation3], 0  ;;  %42 = vperm.xlu0 %84, %v25_v0   ;;  %34 = vperm.xlu1 %85, %v24_v1   ;;  %v23_v3 = vld [vmem:[%s152_s2] sm:$0xff]  ;;  %vm54_vm3 = vcmask 7168  }
   0x4   :  { %v22_v4 = vld [vmem:[%s151_s1] sm:$0xff]  ;;  %s101_s1 = smov [#allocation2]  }
   0x5   :  { %86 = vrcp.f32 %v22_v4  ;;  %v21_v9 = vld [vmem:[%s150_s0] sm:$0xff] }
   0x7   :  { %28 = vperm.xlu0 %84, %v23_v3  }
  0x12   :  { %v87_v5 = vpop.eup %86 }
  0x7e   :  { %v43_v6 = vpop.permute.xlu0 %42  ;;  %v35_v7 = vpop.permute.xlu1 %34 }
  0x7f   :  { %v45_v8 = vsub.f32 %v22_v4, %v43_v6  ;;  %vm37_vm0 = vcmp.lt.f32.partialorder %v22_v4, %v35_v7 }
  0x81   :  { %v46_v10 = vmul.f32 %v87_v5, %v45_v8 }
  0x82   :  { %v29_v11 = vpop.permute.xlu0 %28 }
  0x83   :  { %vm31_vm1 = vcmp.gt.f32.partialorder %v22_v4, %v29_v11  ;;  %v47_v12 = vmul.f32 %v46_v10, %v21_v9 }
  0x84   :  { %vm38_vm2 = vmand %vm31_vm1, %vm37_vm0 }
  0x85   :  { %v48_v13 = vsel %vm38_vm2, %v47_v12, 0.0 }
  0x86   :  { %49 = vadd.xlane.f32.xlu1 %v48_v13 }
 0x10f   :  { %v50_v14 = vpop.xlane.xlu1 %49 }
 0x110   :  { %v51_v15 = vmax.f32 %v50_v14, 1e-08 }
 0x112   :  { %88 = vlog2.f32 %v51_v15 }
 0x11f   :  { %v89_v16 = vpop.eup %88 }
 0x120   :  { %v53_v17 = vmul.f32 0.6931472, %v89_v16 }
 0x122   :  { %v55_v18 = vsel %vm54_vm3, %v53_v17, 0.0 }
 0x123   :  { %56 = vadd.xlane.f32.xlu0 %v55_v18 }
 0x1ac   :  { %v57_v19 = vpop.xlane.xlu0 %56 }
 0x1ad   :  { %v58_v20 = vrot.slane %v57_v19, 4 }
 0x1af   :  { %v59_v21 = vadd.f32 %v58_v20, %v57_v19 }
 0x1b1   :  { %v60_v22 = vrot.slane %v59_v21, 2 }
 0x1b3   :  { %v61_v23 = vadd.f32 %v60_v22, %v59_v21 }
 0x1b5   :  { %v62_v24 = vrot.slane %v61_v23, 1 }
 0x1b7   :  { %v63_v25 = vadd.f32 %v62_v24, %v61_v23 }
 0x1b9   :  { %80 = vpush %v63_v25 }
 0x1ea   :  { %s81_s0 = spop %80 }
 0x1eb   :  { %66 = sst [smem:[#allocation2]] %s81_s0 }
 0x1ec   :  { %74 = dma.smem_to_hbm %s101_s1, 16, %s155_s5, [#allocation3]  }
 0x1ed   :  { %98 = dma.done.wait [#allocation3], 16  }
 0x1ee   :  { %99 = vsyncadd [#allocation3], 4294967280 }
 0x1ef   :  { %78 = sfence }
 0x1f0   :  { %79 = vsyncpa [#allocation3], 1 }

</bundles_post_ra>
